<compile_context>
chip_gen: v7x
topology: tpu7x:2x2x1
jax: 0.10.0
libtpu: 0.0.40
codegen_flags: <defaults>
</compile_context>

<pallas_src>
import math
import functools

import numpy as np
import jax
import jax.numpy as jnp
from jax import lax
from jax.experimental import pallas as pl
from jax.experimental.pallas import tpu as pltpu


_NEG_BIG = -1e30  # finite mask bias (see header comment)


# ----------------------------- kernels -----------------------------------------


def _zoner_fused_kernel(txtm_ref, zone_ref, bias_ref,
                        wt_ref, bt_ref, wz_ref, bz_ref,
                        wjt_ref, bjt_ref, wjz_ref, bjz_ref,
                        logits_ref, pred_ref, score_ref,
                        *, feature_dim, hard_zone):
    """One batch element per grid step:
       ZoneGrader (batched branch) -> argmax over zones -> one-hot gather of the predicted
       zone embedding -> ZoneJudger (single=True branch).  Weights are pre-transposed (D, O)."""
    inv_sqrt_d = 1.0 / math.sqrt(feature_dim)

    txtm = txtm_ref[0]                                   # (1, D)  mean over txt seq (from XLA)
    zone = zone_ref[0]                                   # (Z, D)
    bias = bias_ref[0]                                   # (1, Z)  0 valid / -1e30 padded

    # --- ZoneGrader projections (dropout == identity in eval mode) ---
    txt_p = jnp.tanh(jnp.dot(txtm, wt_ref[...],
                             preferred_element_type=jnp.float32) + bt_ref[...])      # (1, O)
    zone_p = jnp.tanh(jnp.dot(zone, wz_ref[...],
                              preferred_element_type=jnp.float32) + bz_ref[...])     # (Z, O)

    # attn = bmm(zone_p, txt_p^T) / sqrt(D) + mask bias                              # (1, Z)
    attn = lax.dot_general(txt_p, zone_p, (((1,), (1,)), ((), ())),
                           preferred_element_type=jnp.float32)
    attn = attn * inv_sqrt_d + bias

    if hard_zone:
        m = jnp.max(attn, axis=-1, keepdims=True)
        e = jnp.exp(attn - m)
        logits = e * pl.reciprocal(jnp.sum(e, axis=-1, keepdims=True), approx=False)
    else:
        logits = attn
    logits_ref[0] = logits

    # --- argmax over zones (first index attaining the row max; softmax is monotonic) ---
    col = lax.broadcasted_iota(jnp.int32, attn.shape, 1)                             # (1, Z)
    row_max = jnp.max(attn, axis=-1, keepdims=True)
    pred = jnp.min(jnp.where(attn == row_max, col, jnp.iinfo(jnp.int32).max),
                   axis=-1, keepdims=True)                                           # (1, 1)
    pred_ref[0] = pred

    # --- gather the predicted zone embedding via a one-hot matmul (no dynamic indexing) ---
    onehot = (col == pred).astype(zone.dtype)                                        # (1, Z)
    sel_zone = jnp.dot(onehot, zone, preferred_element_type=jnp.float32)             # (1, D)

    # --- ZoneJudger (single=True branch) on the predicted zone embedding ---
    jt = jnp.tanh(jnp.dot(txtm, wjt_ref[...],
                          preferred_element_type=jnp.float32) + bjt_ref[...])        # (1, O)
    jz = jnp.tanh(jnp.dot(sel_zone, wjz_ref[...],
                          preferred_element_type=jnp.float32) + bjz_ref[...])        # (1, O)
    s = jnp.sum(jt * jz, axis=-1, keepdims=True) * inv_sqrt_d                        # (1, 1)
    score_ref[0] = jax.nn.sigmoid(s)


def _zone_judge_kernel(txt_ref, zone_ref, wt_ref, bt_ref, wz_ref, bz_ref, out_ref,
                       *, feature_dim):
    """ZoneGrader forward, single=True branch (the `now_pos != 'start'` rezone check)."""
    txt_p = jnp.tanh(jnp.dot(txt_ref[...], wt_ref[...],
                             preferred_element_type=jnp.float32) + bt_ref[...])
    zone_p = jnp.tanh(jnp.dot(zone_ref[...], wz_ref[...],
                              preferred_element_type=jnp.float32) + bz_ref[...])
    s = jnp.sum(txt_p * zone_p, axis=-1, keepdims=True) * (1.0 / math.sqrt(feature_dim))
    out_ref[...] = jax.nn.sigmoid(s)


# ----------------------------- wrappers ----------------------------------------


def _prep_linear(params, out_dim):
    """torch.nn.Linear (O, D) weight -> (D, O); bias -> (1, O).  Free XLA layout plumbing."""
    return (params["wt"].T, params["bt"].reshape(1, out_dim),
            params["wz"].T, params["bz"].reshape(1, out_dim))


def zoner_hot_path(txt_embeds, zone_embeds, zone_mask, grader_params, judger_params,
                   *, hard_zone=True):
    """Fused Zoner start-step hot path.

    Returns (zone_logits (B,Z), predicted_zone (B,), zone_scores (B,), txt_mean (B,D)).
    txt_mean is returned so callers never recompute the reduction over the txt sequence.
    """
    B, L, D = txt_embeds.shape
    _, Z, _ = zone_embeds.shape
    O = grader_params["wt"].shape[0]

    # torch.mean(txt_embeds, dim=1): computed exactly once, in XLA; the (B, L, D) tensor
    # never enters the kernel / VMEM.
    txt_mean = jnp.mean(txt_embeds, axis=1)

    # additive float mask bias instead of masked_fill(-inf)
    mask_bias = jnp.where(zone_mask != 0, jnp.float32(_NEG_BIG), jnp.float32(0.0))

    wt_t, bt, wz_t, bz = _prep_linear(grader_params, O)      # Zoner.ZoneGrader
    wjt_t, bjt, wjz_t, bjz = _prep_linear(judger_params, O)  # Zoner.ZoneJudger

    kernel = functools.partial(_zoner_fused_kernel, feature_dim=D, hard_zone=hard_zone)

    w_spec = pl.BlockSpec((D, O), lambda b: (0, 0))   # weights stay VMEM-resident across the grid
    b_spec = pl.BlockSpec((1, O), lambda b: (0, 0))

    logits, pred, score = pl.pallas_call(
        kernel,
        out_shape=(jax.ShapeDtypeStruct((B, 1, Z), jnp.float32),
                   jax.ShapeDtypeStruct((B, 1, 1), jnp.int32),
                   jax.ShapeDtypeStruct((B, 1, 1), jnp.float32)),
        grid=(B,),
        in_specs=[pl.BlockSpec((1, 1, D), lambda b: (b, 0, 0)),   # txt_mean
                  pl.BlockSpec((1, Z, D), lambda b: (b, 0, 0)),   # zone_embeds
                  pl.BlockSpec((1, 1, Z), lambda b: (b, 0, 0)),   # mask bias
                  w_spec, b_spec, w_spec, b_spec,                 # ZoneGrader
                  w_spec, b_spec, w_spec, b_spec],                # ZoneJudger
        out_specs=(pl.BlockSpec((1, 1, Z), lambda b: (b, 0, 0)),
                   pl.BlockSpec((1, 1, 1), lambda b: (b, 0, 0)),
                   pl.BlockSpec((1, 1, 1), lambda b: (b, 0, 0))),
        compiler_params=pltpu.CompilerParams(dimension_semantics=("parallel",)),
    )(txt_mean.reshape(B, 1, D), zone_embeds, mask_bias.reshape(B, 1, Z),
      wt_t, bt, wz_t, bz, wjt_t, bjt, wjz_t, bjz)

    return logits.reshape(B, Z), pred.reshape(B), score.reshape(B), txt_mean


def zone_judger_single(txt_mean, zone_vec, judger_params):
    """Standalone ZoneJudger(txt_mean, cur_pos_embeds, single=True) -> (B,) rezone scores."""
    B, D = txt_mean.shape
    O = judger_params["wt"].shape[0]
    wt_t, bt, wz_t, bz = _prep_linear(judger_params, O)

    kernel = functools.partial(_zone_judge_kernel, feature_dim=D)
    out = pl.pallas_call(
        kernel,
        out_shape=jax.ShapeDtypeStruct((B, 1), jnp.float32),
        grid=(1,),
        in_specs=[pl.BlockSpec((B, D), lambda i: (0, 0)),
                  pl.BlockSpec((B, D), lambda i: (0, 0)),
                  pl.BlockSpec((D, O), lambda i: (0, 0)),
                  pl.BlockSpec((1, O), lambda i: (0, 0)),
                  pl.BlockSpec((D, O), lambda i: (0, 0)),
                  pl.BlockSpec((1, O), lambda i: (0, 0))],
        out_specs=pl.BlockSpec((B, 1), lambda i: (0, 0)),
        compiler_params=pltpu.CompilerParams(dimension_semantics=("arbitrary",)),
    )(txt_mean, zone_vec, wt_t, bt, wz_t, bz)
    return out[:, 0]


# ----------------------------- params / reference -------------------------------


def init_zone_grader_params(key, feature_dim, out_feature_dim):
    """Deterministic init mimicking torch.nn.Linear's uniform(-1/sqrt(in), 1/sqrt(in))."""
    k1, k2, k3, k4 = jax.random.split(key, 4)
    bound = 1.0 / math.sqrt(feature_dim)
    u = lambda k, s: jax.random.uniform(k, s, jnp.float32, -bound, bound)
    return {
        "wt": u(k1, (out_feature_dim, feature_dim)),
        "bt": u(k2, (out_feature_dim,)),
        "wz": u(k3, (out_feature_dim, feature_dim)),
        "bz": u(k4, (out_feature_dim,)),
    }


def _ref_batched(txt_embeds, zone_embeds, zone_mask, p, hard_zone=True):
    D = txt_embeds.shape[-1]
    t = jnp.tanh(jnp.mean(txt_embeds, axis=1) @ p["wt"].T + p["bt"])
    z = jnp.tanh(zone_embeds @ p["wz"].T + p["bz"])
    attn = jnp.einsum("bzo,bo->bz", z, t) / math.sqrt(D)
    attn = jnp.where(zone_mask != 0, -jnp.inf, attn)
    return jax.nn.softmax(attn, axis=1) if hard_zone else attn


def _ref_single(txt_mean, zone_vec, p):
    D = txt_mean.shape[-1]
    t = jnp.tanh(txt_mean @ p["wt"].T + p["bt"])
    z = jnp.tanh(zone_vec @ p["wz"].T + p["bz"])
    return jax.nn.sigmoid(jnp.sum(t * z, axis=-1) / math.sqrt(D))


# ----------------------------- main ---------------------------------------------


if __name__ == "__main__":
    B, L, Z, D, O = 2, 8, 8, 32, 32   # batch, txt seq, zones, hidden_size, out_feature_dim

    key = jax.random.PRNGKey(0)
    k_txt, k_zone, k_grader, k_judger = jax.random.split(key, 4)

    txt_embeds = jax.random.normal(k_txt, (B, L, D), jnp.float32)
    zone_embeds = jax.random.normal(k_zone, (B, Z, D), jnp.float32)
    zone_lens = jnp.array([Z, 5], jnp.int32)
    # mask == ~gen_seq_masks(zone_lens): 1 where zone index >= valid length
    zone_mask = (jnp.arange(Z)[None, :] >= zone_lens[:, None]).astype(jnp.int32)

    grader_params = init_zone_grader_params(k_grader, D, O)   # Zoner.ZoneGrader
    judger_params = init_zone_grader_params(k_judger, D, O)   # Zoner.ZoneJudger

    # ---- fused start-step hot path: zone_selection + argmax + gather + ZoneJudger ----
    zone_logits, predicted_zone, zone_scores, txt_mean = zoner_hot_path(
        txt_embeds, zone_embeds, zone_mask, grader_params, judger_params, hard_zone=True)
    zone_judge_logits = jnp.stack([1.0 - zone_scores, zone_scores], axis=1)

    # ---- `now_pos != 'start'` rezone check: ZoneJudger on the current-position embedding ----
    cur_pos_embeds = zone_embeds[:, 0, :]
    rezone_scores = zone_judger_single(txt_mean, cur_pos_embeds, judger_params)

    jax.block_until_ready((zone_logits, predicted_zone, zone_judge_logits, rezone_scores))

    # ---- verify against a pure-JAX reference ----
    ref_logits = _ref_batched(txt_embeds, zone_embeds, zone_mask, grader_params, hard_zone=True)
    ref_pred = jnp.argmax(ref_logits, axis=1)
    ref_sel = zone_embeds[jnp.arange(B), ref_pred, :]
    ref_scores = _ref_single(txt_mean, ref_sel, judger_params)
    ref_rezone = _ref_single(txt_mean, cur_pos_embeds, judger_params)

    np.testing.assert_allclose(np.asarray(zone_logits), np.asarray(ref_logits),
                               rtol=1e-5, atol=1e-5)
    np.testing.assert_array_equal(np.asarray(predicted_zone), np.asarray(ref_pred))
    np.testing.assert_allclose(np.asarray(zone_scores), np.asarray(ref_scores),
                               rtol=1e-5, atol=1e-5)
    np.testing.assert_allclose(np.asarray(rezone_scores), np.asarray(ref_rezone),
                               rtol=1e-5, atol=1e-5)

    print("KERNEL_OK")
</pallas_src>

<mosaic_0001>
module attributes {stable_mosaic.version = 11 : i64} {
  func.func @_zoner_fused_kernel(%arg0: i32, %arg1: memref<1x1x32xf32, #tpu.memory_space<vmem>>, %arg2: memref<1x8x32xf32, #tpu.memory_space<vmem>>, %arg3: memref<1x1x8xf32, #tpu.memory_space<vmem>>, %arg4: memref<32x32xf32, #tpu.memory_space<vmem>>, %arg5: memref<1x32xf32, #tpu.memory_space<vmem>>, %arg6: memref<32x32xf32, #tpu.memory_space<vmem>>, %arg7: memref<1x32xf32, #tpu.memory_space<vmem>>, %arg8: memref<32x32xf32, #tpu.memory_space<vmem>>, %arg9: memref<1x32xf32, #tpu.memory_space<vmem>>, %arg10: memref<32x32xf32, #tpu.memory_space<vmem>>, %arg11: memref<1x32xf32, #tpu.memory_space<vmem>>, %arg12: memref<1x1x8xf32, #tpu.memory_space<vmem>>, %arg13: memref<1x1x1xi32, #tpu.memory_space<vmem>>, %arg14: memref<1x1x1xf32, #tpu.memory_space<vmem>>) attributes {dimension_semantics = [#tpu.dimension_semantics<parallel>], iteration_bounds = array<i64: 2>, scalar_prefetch = 0 : i64, scratch_operands = 0 : i64, tpu.core_type = #tpu.core_type<tc>, window_params = [{transform_indices = @transform_0, window_bounds = array<i64: 1, 1, 32>}, {transform_indices = @transform_1, window_bounds = array<i64: 1, 8, 32>}, {transform_indices = @transform_2, window_bounds = array<i64: 1, 1, 8>}, {pipeline_mode = #tpu.pipeline_mode<synchronous>, transform_indices = @transform_3, window_bounds = array<i64: 32, 32>}, {pipeline_mode = #tpu.pipeline_mode<synchronous>, transform_indices = @transform_4, window_bounds = array<i64: 1, 32>}, {pipeline_mode = #tpu.pipeline_mode<synchronous>, transform_indices = @transform_5, window_bounds = array<i64: 32, 32>}, {pipeline_mode = #tpu.pipeline_mode<synchronous>, transform_indices = @transform_6, window_bounds = array<i64: 1, 32>}, {pipeline_mode = #tpu.pipeline_mode<synchronous>, transform_indices = @transform_7, window_bounds = array<i64: 32, 32>}, {pipeline_mode = #tpu.pipeline_mode<synchronous>, transform_indices = @transform_8, window_bounds = array<i64: 1, 32>}, {pipeline_mode = #tpu.pipeline_mode<synchronous>, transform_indices = @transform_9, window_bounds = array<i64: 32, 32>}, {pipeline_mode = #tpu.pipeline_mode<synchronous>, transform_indices = @transform_10, window_bounds = array<i64: 1, 32>}, {transform_indices = @transform_11, window_bounds = array<i64: 1, 1, 8>}, {transform_indices = @transform_12, window_bounds = array<i64: 1, 1, 1>}, {transform_indices = @transform_13, window_bounds = array<i64: 1, 1, 1>}]} {
    %c0 = arith.constant 0 : index
    %c0_0 = arith.constant 0 : index
    %c0_1 = arith.constant 0 : index
    %0 = vector.load %arg1[%c0, %c0_0, %c0_1] : memref<1x1x32xf32, #tpu.memory_space<vmem>>, vector<1x1x32xf32>
    %1 = vector.shape_cast %0 : vector<1x1x32xf32> to vector<1x32xf32>
    %c0_2 = arith.constant 0 : index
    %c0_3 = arith.constant 0 : index
    %c0_4 = arith.constant 0 : index
    %2 = vector.load %arg2[%c0_2, %c0_3, %c0_4] : memref<1x8x32xf32, #tpu.memory_space<vmem>>, vector<1x8x32xf32>
    %3 = vector.shape_cast %2 : vector<1x8x32xf32> to vector<8x32xf32>
    %c0_5 = arith.constant 0 : index
    %c0_6 = arith.constant 0 : index
    %c0_7 = arith.constant 0 : index
    %4 = vector.load %arg3[%c0_5, %c0_6, %c0_7] : memref<1x1x8xf32, #tpu.memory_space<vmem>>, vector<1x1x8xf32>
    %5 = vector.shape_cast %4 : vector<1x1x8xf32> to vector<1x8xf32>
    %c0_8 = arith.constant 0 : index
    %c0_9 = arith.constant 0 : index
    %6 = vector.load %arg4[%c0_8, %c0_9] : memref<32x32xf32, #tpu.memory_space<vmem>>, vector<32x32xf32>
    %cst = arith.constant dense<0.000000e+00> : vector<1x32xf32>
    %7 = tpu.matmul %1, %6, %cst {dimension_numbers = #tpu.dot_dimension_numbers<[1], [0], [0], [1], [0, 0, 1, 1], [], []>} : vector<1x32xf32>, vector<32x32xf32>, vector<1x32xf32> -> vector<1x32xf32>
    %c0_10 = arith.constant 0 : index
    %c0_11 = arith.constant 0 : index
    %8 = vector.load %arg5[%c0_10, %c0_11] : memref<1x32xf32, #tpu.memory_space<vmem>>, vector<1x32xf32>
    %9 = arith.addf %7, %8 : vector<1x32xf32>
    %10 = math.tanh %9 : vector<1x32xf32>
    %c0_12 = arith.constant 0 : index
    %c0_13 = arith.constant 0 : index
    %11 = vector.load %arg6[%c0_12, %c0_13] : memref<32x32xf32, #tpu.memory_space<vmem>>, vector<32x32xf32>
    %cst_14 = arith.constant dense<0.000000e+00> : vector<8x32xf32>
    %12 = tpu.matmul %3, %11, %cst_14 {dimension_numbers = #tpu.dot_dimension_numbers<[1], [0], [0], [1], [0, 0, 1, 1], [], []>} : vector<8x32xf32>, vector<32x32xf32>, vector<8x32xf32> -> vector<8x32xf32>
    %c0_15 = arith.constant 0 : index
    %c0_16 = arith.constant 0 : index
    %13 = vector.load %arg7[%c0_15, %c0_16] : memref<1x32xf32, #tpu.memory_space<vmem>>, vector<1x32xf32>
    %14 = vector.broadcast %13 : vector<1x32xf32> to vector<8x32xf32>
    %15 = arith.addf %12, %14 : vector<8x32xf32>
    %16 = math.tanh %15 : vector<8x32xf32>
    %cst_17 = arith.constant dense<0.000000e+00> : vector<1x8xf32>
    %17 = tpu.matmul %10, %16, %cst_17 {dimension_numbers = #tpu.dot_dimension_numbers<[1], [1], [0], [0], [0, 0, 1, 0], [], []>} : vector<1x32xf32>, vector<8x32xf32>, vector<1x8xf32> -> vector<1x8xf32>
    %cst_18 = arith.constant 0.176776692 : f32
    %18 = vector.broadcast %cst_18 : f32 to vector<1x8xf32>
    %19 = arith.mulf %17, %18 : vector<1x8xf32>
    %20 = arith.addf %19, %5 : vector<1x8xf32>
    %cst_19 = arith.constant dense<0xFF800000> : vector<1xf32>
    %21 = vector.multi_reduction <maximumf>, %20, %cst_19 [1] : vector<1x8xf32> to vector<1xf32>
    %22 = vector.shape_cast %21 : vector<1xf32> to vector<1x1xf32>
    %23 = vector.broadcast %22 : vector<1x1xf32> to vector<1x8xf32>
    %24 = arith.subf %20, %23 : vector<1x8xf32>
    %25 = math.exp %24 : vector<1x8xf32>
    %cst_20 = arith.constant dense<0.000000e+00> : vector<1xf32>
    %26 = vector.multi_reduction <add>, %25, %cst_20 [1] : vector<1x8xf32> to vector<1xf32>
    %27 = vector.shape_cast %26 : vector<1xf32> to vector<1x1xf32>
    %28 = tpu.reciprocal %27 : vector<1x1xf32> -> vector<1x1xf32>
    %29 = vector.broadcast %28 : vector<1x1xf32> to vector<1x8xf32>
    %30 = arith.mulf %25, %29 : vector<1x8xf32>
    %c0_21 = arith.constant 0 : index
    %c0_22 = arith.constant 0 : index
    %c0_23 = arith.constant 0 : index
    %31 = vector.load %arg12[%c0_21, %c0_22, %c0_23] : memref<1x1x8xf32, #tpu.memory_space<vmem>>, vector<1x1x8xf32>
    %32 = vector.shape_cast %31 : vector<1x1x8xf32> to vector<1x8xf32>
    %33 = vector.shape_cast %30 : vector<1x8xf32> to vector<1x1x8xf32>
    tpu.vector_store %arg12[%c0_21, %c0_22, %c0_23], %33 {strides = array<i32>} : memref<1x1x8xf32, #tpu.memory_space<vmem>>, vector<1x1x8xf32>,
    %34 = tpu.iota {dimensions = array<i32: 1>} : vector<1x8xi32>
    %cst_24 = arith.constant dense<0xFF800000> : vector<1xf32>
    %35 = vector.multi_reduction <maximumf>, %20, %cst_24 [1] : vector<1x8xf32> to vector<1xf32>
    %36 = vector.shape_cast %35 : vector<1xf32> to vector<1x1xf32>
    %37 = vector.broadcast %36 : vector<1x1xf32> to vector<1x8xf32>
    %38 = arith.cmpf oeq, %20, %37 : vector<1x8xf32>
    %c2147483647_i32 = arith.constant 2147483647 : i32
    %39 = vector.broadcast %c2147483647_i32 : i32 to vector<1x8xi32>
    %40 = arith.select %38, %34, %39 : vector<1x8xi1>, vector<1x8xi32>
    %cst_25 = arith.constant dense<2147483647> : vector<1xi32>
    %41 = vector.multi_reduction <minsi>, %40, %cst_25 [1] : vector<1x8xi32> to vector<1xi32>
    %42 = vector.shape_cast %41 : vector<1xi32> to vector<1x1xi32>
    %c0_26 = arith.constant 0 : index
    %c0_27 = arith.constant 0 : index
    %c0_28 = arith.constant 0 : index
    %43 = vector.load %arg13[%c0_26, %c0_27, %c0_28] : memref<1x1x1xi32, #tpu.memory_space<vmem>>, vector<1x1x1xi32>
    %44 = vector.shape_cast %43 : vector<1x1x1xi32> to vector<1x1xi32>
    %45 = vector.shape_cast %42 : vector<1x1xi32> to vector<1x1x1xi32>
    tpu.vector_store %arg13[%c0_26, %c0_27, %c0_28], %45 {strides = array<i32>} : memref<1x1x1xi32, #tpu.memory_space<vmem>>, vector<1x1x1xi32>,
    %46 = vector.broadcast %42 : vector<1x1xi32> to vector<1x8xi32>
    %47 = arith.cmpi eq, %34, %46 : vector<1x8xi32>
    %48 = arith.extui %47 : vector<1x8xi1> to vector<1x8xi32>
    %49 = arith.sitofp %48 : vector<1x8xi32> to vector<1x8xf32>
    %cst_29 = arith.constant dense<0.000000e+00> : vector<1x32xf32>
    %50 = tpu.matmul %49, %3, %cst_29 {dimension_numbers = #tpu.dot_dimension_numbers<[1], [0], [0], [1], [0, 0, 1, 1], [], []>} : vector<1x8xf32>, vector<8x32xf32>, vector<1x32xf32> -> vector<1x32xf32>
    %c0_30 = arith.constant 0 : index
    %c0_31 = arith.constant 0 : index
    %51 = vector.load %arg8[%c0_30, %c0_31] : memref<32x32xf32, #tpu.memory_space<vmem>>, vector<32x32xf32>
    %cst_32 = arith.constant dense<0.000000e+00> : vector<1x32xf32>
    %52 = tpu.matmul %1, %51, %cst_32 {dimension_numbers = #tpu.dot_dimension_numbers<[1], [0], [0], [1], [0, 0, 1, 1], [], []>} : vector<1x32xf32>, vector<32x32xf32>, vector<1x32xf32> -> vector<1x32xf32>
    %c0_33 = arith.constant 0 : index
    %c0_34 = arith.constant 0 : index
    %53 = vector.load %arg9[%c0_33, %c0_34] : memref<1x32xf32, #tpu.memory_space<vmem>>, vector<1x32xf32>
    %54 = arith.addf %52, %53 : vector<1x32xf32>
    %55 = math.tanh %54 : vector<1x32xf32>
    %c0_35 = arith.constant 0 : index
    %c0_36 = arith.constant 0 : index
    %56 = vector.load %arg10[%c0_35, %c0_36] : memref<32x32xf32, #tpu.memory_space<vmem>>, vector<32x32xf32>
    %cst_37 = arith.constant dense<0.000000e+00> : vector<1x32xf32>
    %57 = tpu.matmul %50, %56, %cst_37 {dimension_numbers = #tpu.dot_dimension_numbers<[1], [0], [0], [1], [0, 0, 1, 1], [], []>} : vector<1x32xf32>, vector<32x32xf32>, vector<1x32xf32> -> vector<1x32xf32>
    %c0_38 = arith.constant 0 : index
    %c0_39 = arith.constant 0 : index
    %58 = vector.load %arg11[%c0_38, %c0_39] : memref<1x32xf32, #tpu.memory_space<vmem>>, vector<1x32xf32>
    %59 = arith.addf %57, %58 : vector<1x32xf32>
    %60 = math.tanh %59 : vector<1x32xf32>
    %61 = arith.mulf %55, %60 : vector<1x32xf32>
    %cst_40 = arith.constant dense<0.000000e+00> : vector<1xf32>
    %62 = vector.multi_reduction <add>, %61, %cst_40 [1] : vector<1x32xf32> to vector<1xf32>
    %63 = vector.shape_cast %62 : vector<1xf32> to vector<1x1xf32>
    %cst_41 = arith.constant 0.176776692 : f32
    %64 = vector.broadcast %cst_41 : f32 to vector<1x1xf32>
    %65 = arith.mulf %63, %64 : vector<1x1xf32>
    %66 = arith.negf %65 : vector<1x1xf32>
    %67 = math.exp %66 : vector<1x1xf32>
    %cst_42 = arith.constant 1.000000e+00 : f32
    %68 = vector.broadcast %cst_42 : f32 to vector<1x1xf32>
    %69 = arith.addf %68, %67 : vector<1x1xf32>
    %70 = arith.divf %68, %69 : vector<1x1xf32>
    %c0_43 = arith.constant 0 : index
    %c0_44 = arith.constant 0 : index
    %c0_45 = arith.constant 0 : index
    %71 = vector.load %arg14[%c0_43, %c0_44, %c0_45] : memref<1x1x1xf32, #tpu.memory_space<vmem>>, vector<1x1x1xf32>
    %72 = vector.shape_cast %71 : vector<1x1x1xf32> to vector<1x1xf32>
    %73 = vector.shape_cast %70 : vector<1x1xf32> to vector<1x1x1xf32>
    tpu.vector_store %arg14[%c0_43, %c0_44, %c0_45], %73 {strides = array<i32>} : memref<1x1x1xf32, #tpu.memory_space<vmem>>, vector<1x1x1xf32>,
    return
  }
  func.func @transform_0(%arg0: i32) -> (i32, i32, i32) {
    %c0_i32 = arith.constant 0 : i32
    %c0_i32_0 = arith.constant 0 : i32
    %c0_i32_1 = arith.constant 0 : i32
    return %arg0, %c0_i32, %c0_i32_0 : i32, i32, i32
  }
  func.func @transform_1(%arg0: i32) -> (i32, i32, i32) {
    %c0_i32 = arith.constant 0 : i32
    %c0_i32_0 = arith.constant 0 : i32
    %c0_i32_1 = arith.constant 0 : i32
    return %arg0, %c0_i32, %c0_i32_0 : i32, i32, i32
  }
  func.func @transform_2(%arg0: i32) -> (i32, i32, i32) {
    %c0_i32 = arith.constant 0 : i32
    %c0_i32_0 = arith.constant 0 : i32
    %c0_i32_1 = arith.constant 0 : i32
    return %arg0, %c0_i32, %c0_i32_0 : i32, i32, i32
  }
  func.func @transform_3(%arg0: i32) -> (i32, i32) {
    %c0_i32 = arith.constant 0 : i32
    %c0_i32_0 = arith.constant 0 : i32
    %c0_i32_1 = arith.constant 0 : i32
    return %c0_i32, %c0_i32_0 : i32, i32
  }
  func.func @transform_4(%arg0: i32) -> (i32, i32) {
    %c0_i32 = arith.constant 0 : i32
    %c0_i32_0 = arith.constant 0 : i32
    %c0_i32_1 = arith.constant 0 : i32
    return %c0_i32, %c0_i32_0 : i32, i32
  }
  func.func @transform_5(%arg0: i32) -> (i32, i32) {
    %c0_i32 = arith.constant 0 : i32
    %c0_i32_0 = arith.constant 0 : i32
    %c0_i32_1 = arith.constant 0 : i32
    return %c0_i32, %c0_i32_0 : i32, i32
  }
  func.func @transform_6(%arg0: i32) -> (i32, i32) {
    %c0_i32 = arith.constant 0 : i32
    %c0_i32_0 = arith.constant 0 : i32
    %c0_i32_1 = arith.constant 0 : i32
    return %c0_i32, %c0_i32_0 : i32, i32
  }
  func.func @transform_7(%arg0: i32) -> (i32, i32) {
    %c0_i32 = arith.constant 0 : i32
    %c0_i32_0 = arith.constant 0 : i32
    %c0_i32_1 = arith.constant 0 : i32
    return %c0_i32, %c0_i32_0 : i32, i32
  }
  func.func @transform_8(%arg0: i32) -> (i32, i32) {
    %c0_i32 = arith.constant 0 : i32
    %c0_i32_0 = arith.constant 0 : i32
    %c0_i32_1 = arith.constant 0 : i32
    return %c0_i32, %c0_i32_0 : i32, i32
  }
  func.func @transform_9(%arg0: i32) -> (i32, i32) {
    %c0_i32 = arith.constant 0 : i32
    %c0_i32_0 = arith.constant 0 : i32
    %c0_i32_1 = arith.constant 0 : i32
    return %c0_i32, %c0_i32_0 : i32, i32
  }
  func.func @transform_10(%arg0: i32) -> (i32, i32) {
    %c0_i32 = arith.constant 0 : i32
    %c0_i32_0 = arith.constant 0 : i32
    %c0_i32_1 = arith.constant 0 : i32
    return %c0_i32, %c0_i32_0 : i32, i32
  }
  func.func @transform_11(%arg0: i32) -> (i32, i32, i32) {
    %c0_i32 = arith.constant 0 : i32
    %c0_i32_0 = arith.constant 0 : i32
    %c0_i32_1 = arith.constant 0 : i32
    return %arg0, %c0_i32, %c0_i32_0 : i32, i32, i32
  }
  func.func @transform_12(%arg0: i32) -> (i32, i32, i32) {
    %c0_i32 = arith.constant 0 : i32
    %c0_i32_0 = arith.constant 0 : i32
    %c0_i32_1 = arith.constant 0 : i32
    return %arg0, %c0_i32, %c0_i32_0 : i32, i32, i32
  }
  func.func @transform_13(%arg0: i32) -> (i32, i32, i32) {
    %c0_i32 = arith.constant 0 : i32
    %c0_i32_0 = arith.constant 0 : i32
    %c0_i32_1 = arith.constant 0 : i32
    return %arg0, %c0_i32, %c0_i32_0 : i32, i32, i32
  }
}

</mosaic_0001>

<bundles_post_ra>
// kernel: tpu_custom_call.1
= control target key start
LH: loop header
LB: loop body
LE: loop exit
PB: predicated region body
PF: predicated region fallthrough
CT: control target
= control target key end

     0   :  { %s2459_s0 = inlined_call_operand.hbm [shape: f32[2,1,32], index: 0, kind: input, shape index: {}]   ;;  %s2460_s1 = inlined_call_operand.hbm [shape: f32[2,8,32], index: 1, kind: input, shape index: {}]   ;;  %s2461_s2 = inlined_call_operand.vmem [shape: f32[2,1,8], index: 2, kind: input, shape index: {}]   ;;  %s2462_s3 = inlined_call_operand.hbm [shape: f32[32,32], index: 3, kind: input, shape index: {}]   ;;  %s2463_s4 = inlined_call_operand.hbm [shape: f32[1,32], index: 4, kind: input, shape index: {}]   ;;  %s2464_s5 = inlined_call_operand.hbm [shape: f32[32,32], index: 5, kind: input, shape index: {}]   ;;  %s2465_s6 = inlined_call_operand.hbm [shape: f32[1,32], index: 6, kind: input, shape index: {}]   ;;  %s2466_s7 = inlined_call_operand.hbm [shape: f32[32,32], index: 7, kind: input, shape index: {}]   ;;  %s2467_s8 = inlined_call_operand.hbm [shape: f32[1,32], index: 8, kind: input, shape index: {}]   ;;  %s2468_s9 = inlined_call_operand.vmem [shape: f32[32,32], index: 9, kind: input, shape index: {}]   ;;  %s2469_s10 = inlined_call_operand.vmem [shape: f32[1,32], index: 10, kind: input, shape index: {}]   ;;  %s2470_s11 = inlined_call_operand.hbm [shape: f32[2,1,8], index: 11, kind: output, shape index: {0}]   ;;  %s2471_s12 = inlined_call_operand.vmem [shape: s32[2,1,1], index: 12, kind: output, shape index: {1}]   ;;  %s2472_s13 = inlined_call_operand.vmem [shape: f32[2,1,1], index: 13, kind: output, shape index: {2}]  }
   0x1   :  { %2481 = sst [smem:[#allocation24_spill]] %s2459_s0 }
   0x2   :  { %2482 = sst [smem:[#allocation25_spill]] %s2462_s3 }
   0x3   :  { %2483 = sst [smem:[#allocation26_spill]] %s2463_s4 }
   0x4   :  { %2484 = sst [smem:[#allocation27_spill]] %s2464_s5 }
   0x5   :  { %2485 = sst [smem:[#allocation28_spill]] %s2468_s9 }
   0x6   :  { %2486 = sst [smem:[#allocation29_spill]] %s2469_s10 }
   0x7   :  { %2487 = sst [smem:[#allocation30_spill]] %s2470_s11 }
   0x8   :  { %2488 = sst [smem:[#allocation31_spill]] %s2471_s12 }
   0x9   :  { %2489 = sst [smem:[#allocation32_spill]] %s2472_s13 }
   0xa   :  { %19 = vsyncpa [#allocation3], 0 }
   0xb   :  { %21 = vsyncpa [#allocation3 + $0x1], 0 }
   0xc   :  { %22 = vsyncpa [#allocation6], 0 }
   0xd   :  { %24 = vsyncpa [#allocation6 + $0x1], 0 }
   0xe   :  { %25 = vsyncpa [#allocation9], 0 }
   0xf   :  { %26 = vsyncpa [#allocation12], 0 }
  0x10   :  { %27 = vsyncpa [#allocation15], 0 }
  0x11   :  { %28 = vsyncpa [#allocation4], 0 }
  0x12   :  { %30 = vsyncpa [#allocation4 + $0x1], 0  ;;  %s2009_s25 = smov 0   ;;  %s2011_s26 = smov 0  }
  0x13   :  { %s2013_s27 = smov 0   ;;  %s2015_s28 = smov 0  }
  0x14 LB: > { %s1925_s29 = smov [#allocation7]   ;;  %s2030_s14 = sadd.s32 4294967295, %s1923_s28   ;;  %s1923_s28 = sphi %s2015_s28, %s2526_s28   ;;  %s1919_s27 = sphi %s2013_s27, %s2525_s27   ;;  %s1915_s26 = sphi %s2011_s26, %s2524_s26   ;;  %s1911_s25 = sphi %s2009_s25, %s2523_s25  }
  0x15   : > { %s377_s30 = sshll.u32 %s1925_s29, 4  ;;  %p1342_p0 = scmp.ge.s32.totalorder %s1923_s28, 1  ;;  %s2035_s30 = int_to_ptr.vmem [resolvable:$true] %s377_s30 }
  0x16   : > { %p2477_p1 = scmp.eq.s32.totalorder %s2030_s14, 0  ;;  %p365_p2 = scmp.lt.s32.totalorder %s1923_s28, 3 }
  0x17   : > { %s1926_s16 = smov [#allocation8]   ;;  %s1927_s19 = smov [#allocation11]  }
  0x18   : > { %p2037_p3 = pnand %p1342_p0, %p365_p2  ;;  %s391_s17 = sshll.u32 %s1926_s16, 4  ;;  %s2050_s17 = int_to_ptr.vmem [resolvable:$true] %s391_s17 }
  0x19   : > { %s415_s20 = sshll.u32 %s1927_s19, 4  ;;  %s2492_s3 = sld [smem:[#allocation25_spill]]  ;;  %s2052_s20 = int_to_ptr.vmem [resolvable:$true] %s415_s20 }
  0x1a   : > { %s2490_s15 = scalar_select %p2037_p3, 1, 0 }
  0x1b   : > { %p1506_p5 = pneg %p2037_p3 }
  0x1d   : > { %p2046_p6 = pnand %p1506_p5, %p2477_p1 }
  0x1f   : > { %s1609_s23 = scalar_lea.hbm %s2492_s3, 512  ;;  %p2062_p8 = pneg %p2046_p6 }
  0x20   : > { %p1610_p7 = scmp.ne.s32.totalorder %s2492_s3, %s1609_s23  ;;  %p1616_p11 = scmp.lt.u32.totalorder %s1609_s23, %s2492_s3 }
  0x22   : > { %p1612_p9 = pnand %p2062_p8, %p1610_p7 }
  0x24   : > { %p1613_p10 = pneg %p1612_p9 }
  0x26   : > { %p1618_p12 = pnand %p1616_p11, %p1613_p10 }
  0x28   : > { %1621 = shalt.err (!%p1618_p12)
}
  0x29   : > { %s1622_s21 = scalar_lea.vmem %s2035_s30, 512  ;;  %p1630_p5 = scmp.lt.s32.totalorder %s2035_s30, %s2035_s30 }
  0x2a   : > { %p1623_p13 = scmp.ne.s32.totalorder %s2035_s30, %s1622_s21  ;;  %p1631_p4 = scmp.lt.s32.totalorder %s1622_s21, %s1622_s21 }
  0x2c   : > { %p1625_p0 = pnand %p1623_p13, %p2062_p8  ;;  %p1632_p7 = por %p1631_p4, %p1630_p5 }
  0x2e   : > { %p1626_p2 = pneg %p1625_p0 }
  0x30   : > { %p1633_p9 = pnand %p1632_p7, %p1626_p2 }
  0x32   : > { %1636 = shalt.err (!%p1633_p9)
}
  0x33   : > { %s2475_s22 = smov 128   ;;  %s1929_s13 = smov 8  }
  0x34   : > { %1509 = dma.hbm_to_vmem [thread:$0]  (!%p2046_p6), %s2492_s3, 512, %s2035_s30, [#allocation6], %s2475_s22, %s2475_s22, %s1929_s13  }
  0x35   : > { %s2494_s4 = sld [smem:[#allocation26_spill]] }
  0x3b   : > { %s1637_s21 = scalar_lea.hbm %s2494_s4, 16 }
  0x3c   : > { %p1638_p4 = scmp.ne.s32.totalorder %s2494_s4, %s1637_s21  ;;  %p1644_p12 = scmp.lt.u32.totalorder %s1637_s21, %s2494_s4 }
  0x3e   : > { %p1640_p10 = pnand %p1638_p4, %p2062_p8 }
  0x40   : > { %p1641_p11 = pneg %p1640_p10 }
  0x42   : > { %p1646_p13 = pnand %p1644_p12, %p1641_p11 }
  0x44   : > { %1649 = shalt.err (!%p1646_p13)
}
  0x45   : > { %s1650_s30 = scalar_lea.vmem %s2050_s17, 16  ;;  %s1657_s10 = scalar_lea.vmem %s2050_s17, 32 }
  0x46   : > { %p1651_p0 = scmp.ne.s32.totalorder %s2050_s17, %s1650_s30  ;;  %p1658_p7 = scmp.lt.s32.totalorder %s2050_s17, %s2050_s17 }
  0x47   : > { %p1659_p9 = scmp.lt.s32.totalorder %s1657_s10, %s1650_s30 }
  0x48   : > { %p1653_p2 = pnand %p1651_p0, %p2062_p8 }
  0x49   : > { %p1660_p4 = por %p1659_p9, %p1658_p7 }
  0x4a   : > { %p1654_p5 = pneg %p1653_p2 }
  0x4c   : > { %p1661_p10 = pnand %p1660_p4, %p1654_p5 }
  0x4e   : > { %1664 = shalt.err (!%p1661_p10)
}
  0x4f   : > { %1512 = dma.hbm_to_vmem [thread:$0]  (!%p2046_p6), %s2494_s4, 16, %s2050_s17, [#allocation9]  }
  0x50   : > { %s1665_s24 = scalar_lea.hbm %s2465_s6, 16 }
  0x51   : > { %p1666_p11 = scmp.ne.s32.totalorder %s2465_s6, %s1665_s24  ;;  %p1672_p0 = scmp.lt.u32.totalorder %s1665_s24, %s2465_s6 }
  0x53   : > { %p1668_p12 = pnand %p1666_p11, %p2062_p8 }
  0x55   : > { %p1669_p13 = pneg %p1668_p12 }
  0x57   : > { %p1674_p2 = pnand %p1672_p0, %p1669_p13 }
  0x59   : > { %1677 = shalt.err (!%p1674_p2)
}
  0x5a   : > { %s1678_s17 = scalar_lea.vmem %s2052_s20, 16  ;;  %s1685_s10 = scalar_lea.vmem %s2052_s20, 32 }
  0x5b   : > { %p1679_p5 = scmp.ne.s32.totalorder %s2052_s20, %s1678_s17  ;;  %p1686_p4 = scmp.lt.s32.totalorder %s2052_s20, %s2052_s20 }
  0x5c   : > { %p1687_p10 = scmp.lt.s32.totalorder %s1685_s10, %s1678_s17 }
  0x5d   : > { %p1681_p7 = pnand %p1679_p5, %p2062_p8 }
  0x5e   : > { %p1688_p11 = por %p1687_p10, %p1686_p4 }
  0x5f   : > { %p1682_p9 = pneg %p1681_p7 }
  0x61   : > { %p1689_p12 = pnand %p1688_p11, %p1682_p9 }
  0x63   : > { %1692 = shalt.err (!%p1689_p12)
}
  0x64   : > { %1518 = dma.hbm_to_vmem [thread:$0]  (!%p2046_p6), %s2465_s6, 16, %s2052_s20, [#allocation12]  }
  0x65   : > { %s1930_s12 = smov [#allocation10]   ;;  %s1931_s24 = smov [#allocation13]  }
  0x66   : > { %s401_s23 = sshll.u32 %s1930_s12, 4  ;;  %s425_s29 = sshll.u32 %s1931_s24, 4  ;;  %s402_s23 = int_to_ptr.vmem [resolvable:$true] %s401_s23  ;;  %s426_s29 = int_to_ptr.vmem [resolvable:$true] %s425_s29 }
  0x67   : > { %s2495_s5 = sld [smem:[#allocation27_spill]] }
  0x6d   : > { %s1693_s30 = scalar_lea.hbm %s2495_s5, 512 }
  0x6e   : > { %p1694_p13 = scmp.ne.s32.totalorder %s2495_s5, %s1693_s30  ;;  %p1700_p5 = scmp.lt.u32.totalorder %s1693_s30, %s2495_s5 }
  0x70   : > { %p1696_p0 = pnand %p1694_p13, %p2062_p8 }
  0x72   : > { %p1697_p2 = pneg %p1696_p0 }
  0x74   : > { %p1702_p7 = pnand %p1700_p5, %p1697_p2 }
  0x76   : > { %1705 = shalt.err (!%p1702_p7)
}
  0x77   : > { %s1706_s20 = scalar_lea.vmem %s402_s23, 512  ;;  %p1714_p11 = scmp.lt.s32.totalorder %s402_s23, %s402_s23 }
  0x78   : > { %p1707_p9 = scmp.ne.s32.totalorder %s402_s23, %s1706_s20  ;;  %p1715_p12 = scmp.lt.s32.totalorder %s1706_s20, %s1706_s20 }
  0x7a   : > { %p1709_p4 = pnand %p1707_p9, %p2062_p8  ;;  %p1716_p1 = por %p1715_p12, %p1714_p11 }
  0x7c   : > { %p1710_p10 = pneg %p1709_p4 }
  0x7e   : > { %p1717_p3 = pnand %p1716_p1, %p1710_p10 }
  0x80   : > { %1720 = shalt.err (!%p1717_p3)
}
  0x81   : > { %s2496_s11 = smov 128   ;;  %s1721_s21 = scalar_lea.hbm %s2466_s7, 512 }
  0x82   : > { %1515 = dma.hbm_to_vmem [thread:$0]  (!%p2046_p6), %s2495_s5, 512, %s402_s23, [#allocation9], %s2496_s11, %s2496_s11, %s1929_s13  }
  0x83   : > { %p1722_p1 = scmp.ne.s32.totalorder %s2466_s7, %s1721_s21  ;;  %p1728_p0 = scmp.lt.u32.totalorder %s1721_s21, %s2466_s7 }
  0x85   : > { %p1724_p3 = pnand %p1722_p1, %p2062_p8 }
  0x87   : > { %p1725_p13 = pneg %p1724_p3 }
  0x89   : > { %p1730_p2 = pnand %p1728_p0, %p1725_p13 }
  0x8b   : > { %1733 = shalt.err (!%p1730_p2)
}
  0x8c   : > { %s1734_s20 = scalar_lea.vmem %s426_s29, 512  ;;  %p1742_p4 = scmp.lt.s32.totalorder %s426_s29, %s426_s29 }
  0x8d   : > { %p1735_p5 = scmp.ne.s32.totalorder %s426_s29, %s1734_s20  ;;  %p1743_p10 = scmp.lt.s32.totalorder %s1734_s20, %s1734_s20 }
  0x8f   : > { %p1737_p7 = pnand %p1735_p5, %p2062_p8  ;;  %p1744_p11 = por %p1743_p10, %p1742_p4 }
  0x91   : > { %p1738_p9 = pneg %p1737_p7 }
  0x93   : > { %p1745_p12 = pnand %p1744_p11, %p1738_p9 }
  0x95   : > { %1748 = shalt.err (!%p1745_p12)
}
  0x96   : > { %1521 = dma.hbm_to_vmem [thread:$0]  (!%p2046_p6), %s2466_s7, 512, %s426_s29, [#allocation12], %s2496_s11, %s2496_s11, %s1929_s13  }
  0x97   : > { %s1932_s12 = smov [#allocation14]   ;;  %s1749_s30 = scalar_lea.hbm %s2467_s8, 16 }
  0x98   : > { %s439_s24 = sshll.u32 %s1932_s12, 4  ;;  %p1750_p1 = scmp.ne.s32.totalorder %s2467_s8, %s1749_s30  ;;  %s440_s24 = int_to_ptr.vmem [resolvable:$true] %s439_s24 }
  0x99   : > { %p1756_p0 = scmp.lt.u32.totalorder %s1749_s30, %s2467_s8 }
  0x9a   : > { %p1752_p3 = pnand %p1750_p1, %p2062_p8 }
  0x9c   : > { %p1753_p13 = pneg %p1752_p3 }
  0x9e   : > { %p1758_p2 = pnand %p1756_p0, %p1753_p13 }
  0xa0   : > { %1761 = shalt.err (!%p1758_p2)
}
  0xa1   : > { %s1762_s13 = scalar_lea.vmem %s440_s24, 16  ;;  %s1769_s29 = scalar_lea.vmem %s440_s24, 32 }
  0xa2   : > { %p1763_p5 = scmp.ne.s32.totalorder %s440_s24, %s1762_s13  ;;  %p1770_p4 = scmp.lt.s32.totalorder %s440_s24, %s440_s24 }
  0xa3   : > { %p1771_p10 = scmp.lt.s32.totalorder %s1769_s29, %s1762_s13 }
  0xa4   : > { %p1765_p7 = pnand %p1763_p5, %p2062_p8 }
  0xa5   : > { %p1772_p11 = por %p1771_p10, %p1770_p4 }
  0xa6   : > { %p1766_p9 = pneg %p1765_p7 }
  0xa8   : > { %p1773_p12 = pnand %p1772_p11, %p1766_p9 }
  0xaa   : > { %1776 = shalt.err (!%p1773_p12)
}
  0xab   : > { %1524 = dma.hbm_to_vmem [thread:$0]  (!%p2046_p6), %s2467_s8, 16, %s440_s24, [#allocation15]  }
  0xac   : > { %s1341_s16 = sadd.s32 4294967294, %s1923_s28   ;;  %s2196_s18 = sadd.s32 1, %s1923_s28  }
  0xad   : > { %s40_s22 = ssub.s32 %s1923_s28, %s2196_s18  ;;  %s43_s12 = sadd.s32 1, %s1919_s27 }
  0xae   : > { %p41_p8 = scmp.eq.s32.totalorder %s40_s22, 0  ;;  %p50_p1 = scmp.ne.s32.totalorder %s1919_s27, %s1915_s26 }
  0xaf   : > { %p51_p3 = scmp.eq.s32.totalorder %s1923_s28, 0  ;;  %p56_p13 = scmp.ne.s32.totalorder %s1915_s26, %s1911_s25 }
  0xb0   : > { %s2207_s19 = scalar_select %p41_p8, %s1919_s27, %s43_s12  }
  0xb1   : > { %p2209_p0 = por %p51_p3, %p50_p1  ;;  %p2498_p2 = scmp.eq.s32.totalorder %s2030_s14, 0 }
  0xb2   : > { %p300_p5 = scmp.eq.s32.totalorder %s2030_s14, 1  ;;  %p306_p7 = scmp.eq.s32.totalorder %s1341_s16, 1 }
  0xb3   : > { %p2215_p6 = por %p2498_p2, %p56_p13  ;;  %p1542_p9 = scmp.lt.s32.totalorder %s1923_s28, 2 }
  0xb4   : > { %s2222_s30 = sand.u32 1, %s1919_s27   ;;  %p2224_p4 = por %p300_p5, %p50_p1 }
  0xb5   : > { %s2499_s24 = scalar_select %p2215_p6, 1, 0 }
  0xb6   : > { %s2500_s17 = scalar_select %p2224_p4, 1, 0 }
  0xb7   : > { %p2228_p10 = por %p306_p7, %p56_p13  ;;  %s1350_s9 = sshll.u32 %s1923_s28, 4 }
  0xb8   : > { %s459_s20 = scalar_lea.vmem [#allocation2], %s2222_s30  ;;  %s2502_s0 = sld [smem:[#allocation24_spill]] }
  0xb9   : > { %s2501_s10 = scalar_select %p2228_p10, 1, 0 }
  0xba   : > { %s466_s13 = sshll.u32 %s459_s20, 4  ;;  %p2243_p11 = pnand %p1542_p9, %p2209_p0  ;;  %s2239_s13 = int_to_ptr.vmem [resolvable:$true] %s466_s13 }
  0xbb   : > { %s1351_s12 = sshll.u32 %s2222_s30, 3  ;;  %s457_s20 = scalar_lea.sflag [#allocation3], %s2222_s30 }
  0xbc   : > { %p1779_p8 = pneg %p2243_p11 }
  0xbe   : > { %s2237_s23 = scalar_lea.hbm %s2502_s0, %s1350_s9  ;;  %s1782_s21 = scalar_lea.hbm %s2502_s0, 32 }
  0xbf   : > { %s1777_s3 = scalar_lea.hbm %s2237_s23, 16  ;;  %p1783_p13 = scmp.lt.u32.totalorder %s2237_s23, %s2502_s0 }
  0xc0   : > { %p1778_p12 = scmp.ne.s32.totalorder %s2237_s23, %s1777_s3  ;;  %p1784_p0 = scmp.lt.u32.totalorder %s1782_s21, %s1777_s3 }
  0xc1   : > { %p1786_p5 = scmp.lt.u32.totalorder %s1777_s3, %s2237_s23 }
  0xc2   : > { %p1780_p1 = pnand %p1779_p8, %p1778_p12  ;;  %p1785_p2 = por %p1784_p0, %p1783_p13 }
  0xc4   : > { %p1781_p3 = pneg %p1780_p1  ;;  %p1787_p7 = por %p1786_p5, %p1785_p2 }
  0xc6   : > { %p1788_p9 = pnand %p1787_p7, %p1781_p3 }
  0xc8   : > { %1791 = shalt.err (!%p1788_p9)
}
  0xc9   : > { %s1792_s22 = scalar_lea.vmem %s2239_s13, 16  ;;  %s1933_s9 = smov [#allocation2]  }
  0xca   : > { %p1793_p12 = scmp.ne.s32.totalorder %s2239_s13, %s1792_s22  ;;  %s1797_s29 = sshll.u32 %s1933_s9, 4  ;;  %s1798_s29 = int_to_ptr.vmem [resolvable:$false] %s1797_s29 }
  0xcb   : > { %s1799_s4 = scalar_lea.vmem %s1798_s29, 32  ;;  %p1800_p4 = scmp.lt.s32.totalorder %s2239_s13, %s1798_s29 }
  0xcc   : > { %p1795_p1 = pnand %p1793_p12, %p1779_p8  ;;  %p1801_p13 = scmp.lt.s32.totalorder %s1799_s4, %s1792_s22 }
  0xce   : > { %p1796_p10 = pneg %p1795_p1  ;;  %p1802_p0 = por %p1801_p13, %p1800_p4 }
  0xd0   : > { %p1803_p2 = pnand %p1802_p0, %p1796_p10 }
  0xd2   : > { %1806 = shalt.err (!%p1803_p2)
}
  0xd3   : > { %1528 = dma.hbm_to_vmem [thread:$0]  (!%p2243_p11), %s2237_s23, 16, %s2239_s13, %s457_s20  }
  0xd4   : > { %s1352_s3 = sshll.u32 %s1923_s28, 7  ;;  %s477_s21 = scalar_lea.vmem [#allocation5], %s1351_s12 }
  0xd5   : > { %s484_s11 = sshll.u32 %s477_s21, 4  ;;  %s2281_s22 = scalar_lea.hbm %s2460_s1, %s1352_s3  ;;  %s485_s11 = int_to_ptr.vmem [resolvable:$true] %s484_s11 }
  0xd6   : > { %s2504_s29 = sand.u32 1, %s1923_s28   ;;  %s1807_s5 = scalar_lea.hbm %s2281_s22, 128 }
  0xd7   : > { %s474_s4 = scalar_lea.sflag [#allocation6], %s2504_s29  ;;  %p1808_p4 = scmp.ne.s32.totalorder %s2281_s22, %s1807_s5 }
  0xd8   : > { %s1812_s23 = scalar_lea.hbm %s2460_s1, 256  ;;  %p1813_p5 = scmp.lt.u32.totalorder %s2281_s22, %s2460_s1 }
  0xd9   : > { %p1810_p10 = pnand %p1808_p4, %p1779_p8  ;;  %p1814_p7 = scmp.lt.u32.totalorder %s1812_s23, %s1807_s5 }
  0xda   : > { %p1816_p12 = scmp.lt.u32.totalorder %s1807_s5, %s2281_s22 }
  0xdb   : > { %p1811_p3 = pneg %p1810_p10  ;;  %p1815_p9 = por %p1814_p7, %p1813_p5 }
  0xdd   : > { %p1817_p1 = por %p1816_p12, %p1815_p9 }
  0xdf   : > { %p1818_p13 = pnand %p1817_p1, %p1811_p3 }
  0xe1   : > { %1821 = shalt.err (!%p1818_p13)
}
  0xe2   : > { %s1822_s20 = scalar_lea.vmem %s485_s11, 128  ;;  %s1934_s3 = smov [#allocation5]  }
  0xe3   : > { %p1823_p0 = scmp.ne.s32.totalorder %s485_s11, %s1822_s20  ;;  %s1827_s21 = sshll.u32 %s1934_s3, 4  ;;  %s1828_s21 = int_to_ptr.vmem [resolvable:$false] %s1827_s21 }
  0xe4   : > { %s1829_s9 = scalar_lea.vmem %s1828_s21, 256  ;;  %p1830_p10 = scmp.lt.s32.totalorder %s485_s11, %s1828_s21 }
  0xe5   : > { %p1825_p2 = pnand %p1823_p0, %p1779_p8  ;;  %p1831_p6 = scmp.lt.s32.totalorder %s1829_s9, %s1822_s20 }
  0xe7   : > { %p1826_p4 = pneg %p1825_p2  ;;  %p1832_p5 = por %p1831_p6, %p1830_p10 }
  0xe9   : > { %p1833_p7 = pnand %p1832_p5, %p1826_p4 }
  0xeb   : > { %1836 = shalt.err (!%p1833_p7)
}
  0xec   : > { %1531 = dma.hbm_to_vmem [thread:$0]  (!%p2243_p11), %s2281_s22, 128, %s485_s11, %s474_s4  }
  0xed   : > { %p2505_p3 = scmp.ne.s32.totalorder %s2490_s15, 0 }
  0xee   : > { %s2307_s5 = sand.u32 (!%p2505_p3), 1, %s1915_s26   ;;  %p2506_p8 = scmp.ne.s32.totalorder (!%p2505_p3), %s2499_s24, 0 }
  0xef   : > { %499 = sbr.rel (%p2505_p3) target bundleno = 1769 (0x6e9), region = 64  ;;  %s502_s29 = scalar_lea.sflag (!%p2505_p3), [#allocation3], %s2307_s5 }
  0xf0   : > { %s504_s30 = scalar_lea.vmem (!%p2505_p3), [#allocation2], %s2307_s5 }
  0xf6   : > { %1882 = dma.done.wait (%p2506_p8), %s502_s29, 16  }
  0xf7   : > { %1884 = vsyncadd (%p2506_p8), %s502_s29, 4294967280  ;;  %s509_s16 = sand.u32 1, %s2030_s14   ;;  %s1354_s11 = sshll.u32 %s2307_s5, 3 }
  0xf8   : > { %s510_s15 = scalar_lea.sflag [#allocation6], %s509_s16  ;;  %s2317_s22 = scalar_lea.vmem [#allocation5], %s1354_s11 }
  0xf9   : > { %1886 = dma.done.wait (%p2506_p8), %s510_s15, 128  }
  0xfa   : > { %1888 = vsyncadd (%p2506_p8), %s510_s15, 4294967168  ;;  %p2507_p6 = scmp.eq.s32.totalorder %s2030_s14, 0 }
  0xfc   : > { %1890 = dma.done.wait (%p2507_p6), [#allocation6], 512   ;;  %p2508_p11 = pmov %p2507_p6 }
  0xfd   : > { %p2509_p9 = pmov %p2507_p6 }
  0xfe   : > { %1892 = vsyncadd (%p2508_p11), [#allocation6], 4294966784 }
  0xff   : > { %1894 = dma.done.wait (%p2509_p9), [#allocation9], 528   ;;  %p2510_p12 = pmov %p2507_p6 }
 0x100   : > { %p2511_p1 = pmov %p2507_p6 }
 0x101   : > { %1896 = vsyncadd (%p2510_p12), [#allocation9], 4294966768 }
 0x102   : > { %1898 = dma.done.wait (%p2511_p1), [#allocation12], 528   ;;  %p2512_p13 = pmov %p2511_p1 }
 0x103   : > { %p2513_p0 = pmov %p2511_p1 }
 0x104   : > { %1900 = vsyncadd (%p2512_p13), [#allocation12], 4294966768 }
 0x105   : > { %1902 = dma.done.wait (%p2513_p0), [#allocation15], 16   ;;  %p2514_p2 = pmov %p2513_p0 }
 0x106   : > { %v1935_v0 = vmov 0.0|0.0   ;;  %vm1936_vm0 = vmmov 0   ;;  %v1937_v1 = vmov 0.0   ;;  %v684_v2 = vld [vmem:[#allocation10] sm:$0xff]  ;;  %v685_v3 = vld [vmem:[#allocation10 + $0x8] sm:$0xff]  ;;  %v686_v7 = vld [vmem:[#allocation10 + $0x10] sm:$0xff]  ;;  %v860_v32 = vlaneseq }
 0x107   : > { %1904 = vsyncadd (%p2514_p2), [#allocation15], 4294967280  ;;  %1458 = vmatprep.subr.bf16.mxu1 %v1935_v0  ;;  %1452 = vmatprep.subr.bf16.mxu0 %v1935_v0  ;;  %v604_v4 = vld [vmem:[#allocation7] sm:$0xff]  ;;  %v1459_v5 = vpack.c.bf16 %v685_v3, %v684_v2  ;;  %v605_v6 = vld [vmem:[#allocation7 + $0x8] sm:$0xff]  ;;  %vm609_vm1 = vcmask 261120   ;;  %p592_p4 = scmp.lt.s32.totalorder %s2030_s14, 1 }
 0x108   : > { %1417 = vmatprep.mubr.msk.f32.mxu1 %vm1936_vm0, %v1937_v1  ;;  %1406 = vmatprep.mubr.msk.f32.mxu0 %vm1936_vm0, %v1937_v1  ;;  %v687_v8 = vld [vmem:[#allocation10 + $0x18] sm:$0xff]  ;;  %v1453_v9 = vpack.c.bf16 %v605_v6, %v604_v4  ;;  %v606_v10 = vld [vmem:[#allocation7 + $0x10] sm:$0xff]  ;;  %v2350_v15 = vld [vmem:[%s504_s30] sm:$0x1]  ;;  %vm847_vm2 = vcmask 57344   ;;  %v861_v33 = vand.u32 127, %v860_v32 }
 0x109   : > { %v607_v11 = vld [vmem:[#allocation7 + $0x18] sm:$0xff]  ;;  %1460 = vmatpush3.bf16.msra.mxu1 %v1459_v5  ;;  %v1462_v12 = vpack.c.bf16 %v687_v8, %v686_v7  ;;  %v1362_v16 = vld [vmem:[#allocation11] ss:$0 sm:$0xff]  ;;  %v608_v17 = vld [vmem:[#allocation8] sm:$0x1]  ;;  %s2369_s24 = scalar_select %p592_p4, %s2030_s14, 1 }
 0x10a   : > { %1454 = vmatpush3.bf16.msra.mxu0 %v1453_v9  ;;  %1461 = vmatprep.subr.bf16.mxu1 %v1935_v0  ;;  %v1456_v13 = vpack.c.bf16 %v607_v11, %v606_v10  ;;  %v602_v14 = vld [vmem:[%s2317_s22] sm:$0xff]  ;;  %v958_v50 = vld [vmem:[#allocation13] sm:$0xff]  ;;  %s581_s0 = scalar_lea.vmem [#allocation16], %s2307_s5  ;;  %s2515_s3 = sld [smem:[#allocation28_spill]]  ;;  %vm879_vm5 = vcmask 0   ;;  %vm884_vm6 = vcmask 64512  }
 0x10b   : > { %1455 = vmatprep.subr.bf16.mxu0 %v1935_v0  ;;  %s594_s23 = scalar_lea.vmem %s2461_s2, %s2369_s24  ;;  %v959_v51 = vld [vmem:[#allocation13 + $0x8] sm:$0xff]  ;;  %v960_v53 = vld [vmem:[#allocation13 + $0x10] sm:$0xff]  ;;  %v961_v54 = vld [vmem:[#allocation13 + $0x18] sm:$0xff]  ;;  %s2516_s16 = sld [smem:[#allocation31_spill]]  ;;  %vm1114_vm8 = vcmask 253952  }
 0x10c   : > { %v603_v26 = vld [vmem:[%s594_s23] sm:$0x1]  ;;  %v1465_v52 = vpack.c.bf16 %v959_v51, %v958_v50  ;;  %v1468_v55 = vpack.c.bf16 %v961_v54, %v960_v53  ;;  %v962_v10 = vld [vmem:[#allocation14] sm:$0x1]  ;;  %s2517_s20 = sld [smem:[#allocation29_spill]]  ;;  %s1371_s21 = sshll.u32 %s2030_s14, 4 }
 0x10d   : > { %1463 = vmatpush3.bf16.msra.mxu1 %v1462_v12  ;;  %s1145_s9 = sshll.u32 %s581_s0, 4  ;;  %s1127_s15 = scalar_lea.sflag [#allocation4], %s2307_s5  ;;  %s1146_s9 = int_to_ptr.vmem [resolvable:$true] %s1145_s9 }
 0x10e   : > { %1457 = vmatpush3.bf16.msra.mxu0 %v1456_v13  ;;  %1425 = vmatprep.subr.mxu1 %v1937_v1  ;;  %s1837_s22 = scalar_lea.vmem %s1146_s9, 16  ;;  %p2519_p5 = scmp.ne.s32.totalorder %s2500_s17, 0 }
 0x10f   : > { %1420 = vmatprep.subr.mxu0 %v1937_v1  ;;  %p1838_p10 = scmp.ne.s32.totalorder %s1146_s9, %s1837_s22  ;;  %s1938_s4 = smov [#allocation16]  }
 0x110   : > { %1418 = vmatmul.mubr.msk.f32.vlgmr.msra.gmra.mrb[0].mxu1 %vm609_vm1, %v602_v14  ;;  %v1034_v60 = vld [vmem:[%s2515_s3] sm:$0xff]  ;;  %v1035_v61 = vld [vmem:[%s2515_s3 + $0x8] sm:$0xff]  ;;  %v1036_v2 = vld [vmem:[%s2515_s3 + $0x10] sm:$0xff]  ;;  %s1841_s13 = sshll.u32 %s1938_s4, 4  ;;  %s1842_s13 = int_to_ptr.vmem [resolvable:$false] %s1841_s13 }
 0x111   : > { %1407 = vmatmul.mubr.msk.f32.vlgmr.msra.gmra.mrb[0].mxu0 %vm609_vm1, %v2350_v15  ;;  %1426 = vmatpush3.msra.mxu1 %v602_v14  ;;  %s597_s11 = scalar_lea.vmem %s2516_s16, %s2369_s24  ;;  %v1471_v63 = vpack.c.bf16 %v1035_v61, %v1034_v60  ;;  %v1037_v3 = vld [vmem:[%s2515_s3 + $0x18] sm:$0xff]  ;;  %s2518_s16 = sld [smem:[#allocation30_spill]] }
 0x112   : > { %1422 = vmatprep.mubr.msk.f32.mxu0 %vm1936_vm0, %v1937_v1  ;;  %1427 = vmatprep.mubr.msk.f32.mxu1 %vm1936_vm0, %v1937_v1  ;;  %v1474_v5 = vpack.c.bf16 %v1037_v3, %v1036_v2  ;;  %v1038_v12 = vld [vmem:[%s2517_s20] sm:$0x1]  ;;  %p1839_p7 = pnand %p1838_p10, %p2519_p5  ;;  %s1843_s23 = scalar_lea.vmem %s1842_s13, 32 }
 0x113   : > { %1470 = vmatprep.subr.bf16.mxu1 %v1935_v0  ;;  %p1844_p8 = scmp.lt.s32.totalorder %s1146_s9, %s1842_s13  ;;  %p1845_p6 = scmp.lt.s32.totalorder %s1843_s23, %s1837_s22 }
 0x114   : > { %p1840_p3 = pneg %p1839_p7 }
 0x115   : > { %p1846_p11 = por %p1845_p6, %p1844_p8 }
 0x117   : > { %p1847_p9 = pnand %p1846_p11, %p1840_p3 }
 0x1e3   : > { %v764_v18 = vpop.f32.mrb[0].mxu1 }
 0x1e4   : > { %v765_v19 = vadd.f32 %v1362_v16, %v764_v18  ;;  %v1419_v20 = vpop.f32.mrb[1].mxu1  ;;  %v679_v21 = vpop.f32.mrb[0].mxu0 }
 0x1e5   : > { %v680_v22 = vadd.f32 %v679_v21, %v608_v17  ;;  %v1408_v23 = vpop.f32.mrb[1].mxu0 }
 0x1e6   : > { %1593 = vtanh.f32 %v765_v19 }
 0x1e7   : > { %1595 = vtanh.f32 %v680_v22 }
 0x1f0   : > { %v1594_v24 = vpop.eup %1593 }
 0x1f1   : > { %v1596_v25 = vpop.eup %1595  ;;  %1421 = vmatpush3.xpose.msk.msra.mxu0 %vm609_vm1, %v1594_v24 }
 0x1f2   : > { %1464 = vmatprep.subr.bf16.mxu0 %v1935_v0 }
 0x1f4   : > { %1423 = vmatmul.mubr.msk.f32.vlgmr.msra.gmra.mrb[2].mxu0 %vm609_vm1, %v1596_v25 }
 0x1f5   : > { %1438 = vmatprep.mubr.msk.f32.mxu0 %vm1936_vm0, %v1937_v1  ;;  %1466 = vmatpush3.bf16.msra.mxu0 %v1465_v52 }
 0x1f6   : > { %1467 = vmatprep.subr.bf16.mxu0 %v1935_v0 }
 0x1f9   : > { %1469 = vmatpush3.bf16.msra.mxu0 %v1468_v55 }
 0x1fc   : > { %1439 = vmatmul.mubr.msk.f32.vlgmr.msra.gmra.mrb[4].mxu0 %vm609_vm1, %v2350_v15 }
 0x2c7   : > { %v841_v27 = vpop.f32.mrb[2].mxu0 }
 0x2c8   : > { %v845_v28 = vmul.f32 0.17677669, %v841_v27  ;;  %v1424_v29 = vpop.f32.mrb[3].mxu0 }
 0x2ca   : > { %v846_v30 = vadd.f32 %v845_v28, %v603_v26 }
 0x2cc   : > { %v848_v31 = vsel %vm847_vm2, %v846_v30, -inf }
 0x2cd   : > { %849 = vmax.xlane.f32.xlu0 %v848_v31 }
 0x2cf   : > { %v1029_v6 = vpop.f32.mrb[4].mxu0 }
 0x2d0   : > { %v1440_v7 = vpop.f32.mrb[5].mxu0  ;;  %v1030_v11 = vadd.f32 %v1029_v6, %v962_v10 }
 0x35a   : > { %v850_v34 = vpop.xlane.xlu0 %849 }
 0x35b   : > { %v851_v35 = vsub.f32 %v846_v30, %v850_v34  ;;  %vm862_vm3 = vcmp.eq.f32.partialorder %v846_v30, %v850_v34 }
 0x35c   : > { %v863_v36 = vsel %vm862_vm3, %v861_v33, 2147483647 }
 0x35d   : > { %v852_v37 = vmul.f32 1.442695, %v851_v35  ;;  %v864_v38 = vsel %vm847_vm2, %v863_v36, 2147483647 }
 0x35e   : > { %v866_v39 = vshra.s32 %v864_v38, 16  ;;  %v865_v43 = vand.u32 65535, %v864_v38 }
 0x35f   : > { %1597 = vpow2.f32 %v852_v37 }
 0x360   : > { %v868_v40 = vcvt.s32.f32 %v866_v39  ;;  %v867_v45 = vcvt.s32.f32 %v865_v43 }
 0x362   : > { %869 = vmin.xlane.f32.xlu0 %v868_v40 }
 0x369   : > { %v1598_v41 = vpop.eup %1597 }
 0x36a   : > { %v854_v42 = vsel %vm847_vm2, %v1598_v41, 0.0 }
 0x36b   : > { %855 = vadd.xlane.f32.xlu0 %v854_v42 }
 0x3ef   : > { %v870_v44 = vpop.xlane.xlu0 %869 }
 0x3f0   : > { %vm871_vm4 = vcmp.eq.f32.partialorder %v868_v40, %v870_v44  ;;  %v876_v56 = vcvt.f32.s32 %v870_v44 }
 0x3f1   : > { %v872_v46 = vsel %vm871_vm4, %v867_v45, inf }
 0x3f2   : > { %873 = vmin.xlane.f32.xlu1 %v872_v46  ;;  %v877_v58 = vshll.u32 %v876_v56, 16 }
 0x3f8   : > { %v856_v47 = vpop.xlane.xlu0 %855 }
 0x3f9   : > { %1599 = vrcp.f32 %v856_v47 }
 0x3fa   : > { %1601 = vtanh.f32 %v1030_v11 }
 0x403   : > { %v1600_v48 = vpop.eup %1599 }
 0x404   : > { %v858_v49 = vmul.f32 %v1600_v48, %v1598_v41  ;;  %v1602_v14 = vpop.eup %1601 }
 0x406   : > { %859 = vst.msk [vmem:[%s581_s0] sm:$0x1] %vm847_vm2, %v858_v49 }
 0x47f   : > { %v874_v57 = vpop.xlane.xlu1 %873 }
 0x480   : > { %v875_v59 = vcvt.f32.s32 %v874_v57 }
 0x482   : > { %v878_v62 = vadd.s32 %v877_v58, %v875_v59 }
 0x484   : > { %880 = vst.msk [vmem:[%s597_s11] sm:$0x1] %vm879_vm5, %v878_v62  ;;  %vm881_vm7 = vcmp.eq.s32.totalorder %v861_v33, %v878_v62  ;;  %s2416_s11 = scalar_lea.hbm %s2518_s16, %s1371_s21 }
 0x485   : > { %v1366_v4 = vsel %vm881_vm7, 1.0, %v1937_v1 }
 0x486   : > { %1428 = vmatmul.mubr.msk.f32.vlgmr.msra.gmra.mrb[2].mxu1 %vm884_vm6, %v1366_v4 }
 0x487   : > { %1472 = vmatpush3.bf16.msra.mxu1 %v1471_v63  ;;  %1449 = vmatprep.mubr.msk.f32.mxu1 %vm1936_vm0, %v1937_v1 }
 0x488   : > { %1473 = vmatprep.subr.bf16.mxu1 %v1935_v0 }
 0x48b   : > { %1475 = vmatpush3.bf16.msra.mxu1 %v1474_v5 }
 0x559   : > { %v954_v8 = vpop.f32.mrb[2].mxu1 }
 0x55a   : > { %v1429_v9 = vpop.f32.mrb[3].mxu1  ;;  %1450 = vmatmul.mubr.msk.f32.vlgmr.msra.gmra.mrb[4].mxu1 %vm609_vm1, %v954_v8 }
 0x62d   : > { %v1108_v13 = vpop.f32.mrb[4].mxu1 }
 0x62e   : > { %v1109_v1 = vadd.f32 %v1108_v13, %v1038_v12  ;;  %v1451_v0 = vpop.f32.mrb[5].mxu1 }
 0x630   : > { %1603 = vtanh.f32 %v1109_v1 }
 0x63a   : > { %v1604_v15 = vpop.eup %1603 }
 0x63b   : > { %v1113_v16 = vmul.f32 %v1604_v15, %v1602_v14 }
 0x63d   : > { %v1115_v17 = vsel %vm1114_vm8, %v1113_v16, 0.0 }
 0x63e   : > { %1116 = vadd.xlane.f32.xlu1 %v1115_v17 }
 0x63f   : > { %1850 = shalt.err (!%p1847_p9)
}
 0x640   : > { %s1851_s14 = scalar_lea.hbm %s2416_s11, 16  ;;  %s1855_s12 = scalar_lea.hbm %s2518_s16, 32 }
 0x641   : > { %p1852_p12 = scmp.ne.s32.totalorder %s2416_s11, %s1851_s14  ;;  %p1856_p0 = scmp.lt.u32.totalorder %s2416_s11, %s2518_s16 }
 0x642   : > { %p1857_p2 = scmp.lt.u32.totalorder %s1855_s12, %s1851_s14  ;;  %p1859_p10 = scmp.lt.u32.totalorder %s1851_s14, %s2416_s11 }
 0x643   : > { %p1853_p1 = pnand %p1852_p12, %p2519_p5 }
 0x644   : > { %p1858_p4 = por %p1857_p2, %p1856_p0 }
 0x645   : > { %p1854_p13 = pneg %p1853_p1 }
 0x646   : > { %p1860_p7 = por %p1859_p10, %p1858_p4 }
 0x648   : > { %p1861_p3 = pnand %p1860_p7, %p1854_p13 }
 0x64a   : > { %1864 = shalt.err (!%p1861_p3)
}
 0x64b   : > { %1504 = dma.vmem_to_hbm [thread:$0]  (%p2519_p5), %s1146_s9, 16, %s2416_s11, %s1127_s15  }
 0x64c   : > { %s2520_s22 = sld [smem:[#allocation32_spill]] }
 0x652   : > { %s600_s4 = scalar_lea.vmem %s2520_s22, %s2369_s24 }
 0x6cb   : > { %v1117_v18 = vpop.xlane.xlu1 %1116 }
 0x6cc   : > { %v1370_v19 = vmul.f32 -0.17677669, %v1117_v18 }
 0x6ce   : > { %v1120_v20 = vmul.f32 1.442695, %v1370_v19 }
 0x6d0   : > { %1605 = vpow2.f32 %v1120_v20 }
 0x6da   : > { %v1606_v21 = vpop.eup %1605 }
 0x6db   : > { %v1122_v22 = vadd.f32 1.0, %v1606_v21 }
 0x6dd   : > { %1607 = vrcp.f32 %v1122_v22 }
 0x6e7   : > { %v1608_v23 = vpop.eup %1607 }
 0x6e8   : > { %1125 = vst.msk [vmem:[%s600_s4] sm:$0x1] %vm879_vm5, %v1608_v23 }
 0x6e9 PF: > { %s1163_s17 = sand.u32 1, %s1911_s25   ;;  %p2521_p5 = scmp.ne.s32.totalorder %s2501_s10, 0 }
 0x6ea   : > { %p2522_p8 = scmp.ge.s32.totalorder %s1923_s28, 2  ;;  %s1164_s9 = scalar_lea.sflag [#allocation4], %s1163_s17 }
 0x6ec   : > { %p1533_p6 = pnand %p2522_p8, %p2521_p5 }
 0x6ee   : > { %1906 = dma.done.wait (!%p1533_p6), %s1164_s9, 16  }
 0x6ef   : > { %1908 = vsyncadd (!%p1533_p6), %s1164_s9, 4294967280  ;;  %p33_p11 = scmp.ge.s32.totalorder %s2196_s18, 4   ;;  %s2523_s25 = smov %s1915_s26 }
 0x6f0   : > { %s2524_s26 = smov %s1919_s27  ;;  %s2525_s27 = smov %s2207_s19 }
 0x6f1   : > { %s2526_s28 = smov %s2196_s18  ;;  %35 = sbr.rel (!%p33_p11) target bundleno = 20 (0x14), region = 173 }
 0x6f8   :  { %1180 = vsyncpa [#allocation3], 1 }
 0x6f9   :  { %1182 = vsyncpa [#allocation3 + $0x1], 1 }
 0x6fa   :  { %1183 = vsyncpa [#allocation6], 1 }
 0x6fb   :  { %1185 = vsyncpa [#allocation6 + $0x1], 1 }
 0x6fc   :  { %1186 = vsyncpa [#allocation9], 1 }
 0x6fd   :  { %1187 = vsyncpa [#allocation12], 1 }
 0x6fe   :  { %1188 = vsyncpa [#allocation15], 1 }
 0x6ff   :  { %1189 = vsyncpa [#allocation4], 1 }
 0x700   :  { %1191 = vsyncpa [#allocation4 + $0x1], 1 }

</bundles_post_ra>
